<compile_context>
chip_gen: v6e
topology: v6e:2x2x1
jax: 0.10.0
libtpu: 0.0.40
codegen_flags: <defaults>
</compile_context>

<pallas_src>
import functools

import jax
import jax.numpy as jnp
import numpy as np
from jax.experimental import pallas as pl
from jax.experimental.pallas import tpu as pltpu


def _basic_block_kernel(x_ref, scale_ref, shift_ref, wf_ref, masks_ref,
                        out_ref, *, NB, H, W, C_in_p, C_out):
    """One grid step == NB batch elements folded onto the lane axis.

    x_ref:     (NB, C_in_p, HW)   input chunk (channels zero-padded to x8)
    scale_ref: (C_in_p, 1)        folded BN scale = gamma / sqrt(var + eps)
    shift_ref: (C_in_p, 1)        folded BN shift = beta - mean * scale
    wf_ref:    (C_out, 9*C_in_p)  conv weights, wf[o, t*C_in_p + i], t=kh*3+kw
    masks_ref: (9, NB*HW)         per-tap source-validity masks over lanes
    out_ref:   (NB, C_out, HW)    conv output chunk (channel concat is outside)
    """
    HW = H * W
    NHW = NB * HW

    # Fold the NB batch elements onto lanes: (NB, C, HW) -> (C, NB*HW).
    # HW is a multiple of 128, so this is an aligned vreg placement.
    x = jnp.concatenate([x_ref[n] for n in range(NB)], axis=-1)

    # BatchNorm (inference, folded) + ReLU (f32, VPU), full sublane groups.
    a = jnp.maximum(x * scale_ref[...] + shift_ref[...], 0.0)

    # 9 shifted taps built in registers with XLU rolls (no VMEM scratch,
    # no unaligned lane slices).  For tap t=(kh,kw), s=(kh-1)*W+(kw-1):
    #   tap[c, i] = a[c, i+s]  where the source pixel (h+kh-1, w+kw-1) is
    #   inside the image, 0 otherwise (the mask also kills any wrap-around
    #   across image rows / batch elements / the array boundary).
    taps = []
    for kh in range(3):
        for kw in range(3):
            t = kh * 3 + kw
            s = (kh - 1) * W + (kw - 1)
            tap = a if s == 0 else pltpu.roll(a, shift=(-s) % NHW, axis=1)
            if t != 4:                                  # centre tap: all valid
                tap = tap * masks_ref[pl.ds(t, 1), :]   # (1, NHW) sublane bcast
            taps.append(tap)
    # Channel padding makes this a tile-aligned (multiple-of-8) sublane concat.
    a9 = jnp.concatenate(taps, axis=0)                  # (9*C_in_p, NB*HW)

    # 3x3 "same" conv for the whole chunk == ONE MXU matmul, constant weights
    # as the stationary LHS: (C_out, 9*C_in_p) @ (9*C_in_p, NB*HW).
    conv = jnp.dot(wf_ref[...], a9, preferred_element_type=jnp.float32)

    # Dropout: eval mode => identity.
    # TODO(synk): training-mode dropout (pltpu.prng_*) and batch-stats BN.
    # Un-fold the batch: HW-aligned, lane-dense slice stores.
    for n in range(NB):
        out_ref[n] = conv[:, n * HW:(n + 1) * HW]


def basic_block_forward(x_nchw, gamma, beta, running_mean, running_var,
                        conv_w_oihw, eps=1e-5):
    """BasicBlock forward (eval-mode BN & dropout).  NCHW in, NCHW out."""
    N, C_in, H, W = x_nchw.shape
    C_out = conv_w_oihw.shape[0]
    HW = H * W
    assert HW % 128 == 0, "flattened spatial axis must be a multiple of 128"

    # Each grid step processes NB batch elements folded onto the lane axis so
    # the conv is one big MXU matmul per step.  At this size the whole batch
    # fits in a single step.
    # TODO(synk): for big C/H/W, tile over H with a 2-row halo as a second
    #             grid axis and set vmem_limit_bytes explicitly (v7x: 64 MiB).
    NB = N
    assert N % NB == 0

    x2 = x_nchw.reshape(N, C_in, HW).astype(jnp.float32)

    # Pad channels to a multiple of 8 so sublane groups are full and the
    # in-kernel tap concat is tile-aligned.  Padded rows are zero everywhere
    # (x, scale, shift, weights) so they contribute nothing.
    C_in_p = -(-C_in // 8) * 8
    pad_c = C_in_p - C_in
    x_pad = jnp.pad(x2, ((0, 0), (0, pad_c), (0, 0))) if pad_c else x2
    w_pad = (jnp.pad(conv_w_oihw, ((0, 0), (0, pad_c), (0, 0), (0, 0)))
             if pad_c else conv_w_oihw)

    # OIHW -> (C_out, kh, kw, C_in_p) -> (C_out, 9*C_in_p)
    wf = jnp.transpose(w_pad, (0, 2, 3, 1)).reshape(C_out, 9 * C_in_p)
    wf = wf.astype(jnp.float32)
    # TODO(synk): cast wf + tap operand to bf16 at real DenseNet sizes
    #             (needs a looser self-test tolerance).

    scale = (gamma / jnp.sqrt(running_var + eps)).astype(jnp.float32)
    shift = (beta - running_mean * scale).astype(jnp.float32)
    if pad_c:
        scale = jnp.pad(scale, (0, pad_c))
        shift = jnp.pad(shift, (0, pad_c))

    # Per-tap source-validity masks over the lane axis, precomputed on host
    # (function of (h, w) only); one row per tap, broadcast over channels
    # inside the kernel.
    h_idx = np.arange(HW, dtype=np.int64) // W
    w_idx = np.arange(HW, dtype=np.int64) % W
    masks = np.empty((9, HW), np.float32)
    for kh in range(3):
        for kw in range(3):
            valid = ((h_idx + (kh - 1) >= 0) & (h_idx + (kh - 1) < H) &
                     (w_idx + (kw - 1) >= 0) & (w_idx + (kw - 1) < W))
            masks[kh * 3 + kw] = valid.astype(np.float32)
    masks = jnp.asarray(np.tile(masks, (1, NB)))          # (9, NB*HW)

    kernel = functools.partial(_basic_block_kernel, NB=NB, H=H, W=W,
                               C_in_p=C_in_p, C_out=C_out)

    conv = pl.pallas_call(
        kernel,
        out_shape=jax.ShapeDtypeStruct((N, C_out, HW), jnp.float32),
        grid=(N // NB,),
        in_specs=[
            pl.BlockSpec((NB, C_in_p, HW), lambda b: (b, 0, 0)),
            pl.BlockSpec((C_in_p, 1), lambda b: (0, 0)),
            pl.BlockSpec((C_in_p, 1), lambda b: (0, 0)),
            pl.BlockSpec((C_out, 9 * C_in_p), lambda b: (0, 0)),
            pl.BlockSpec((9, NB * HW), lambda b: (0, 0)),
        ],
        out_specs=pl.BlockSpec((NB, C_out, HW), lambda b: (b, 0, 0)),
        compiler_params=pltpu.CompilerParams(
            dimension_semantics=("parallel",)),
    )(x_pad, scale[:, None], shift[:, None], wf, masks)

    # torch.cat([x, out], 1): the identity passthrough never enters the
    # kernel's vector-store path; XLA does the HBM-side concat.
    # TODO(synk): in a real DenseNet chain, let the caller own the growing
    #             feature buffer and write conv channels in place via
    #             input_output_aliases instead of this concat.
    out = jnp.concatenate([x2, conv], axis=1)
    return out.reshape(N, C_in + C_out, H, W)


def reference_forward(x, gamma, beta, mean, var, w_oihw, eps=1e-5):
    """Pure-JAX reference (eval-mode BN, no dropout)."""
    inv = 1.0 / jnp.sqrt(var + eps)
    xn = (x - mean[None, :, None, None]) * inv[None, :, None, None]
    a = jnp.maximum(xn * gamma[None, :, None, None]
                    + beta[None, :, None, None], 0.0)
    out = jax.lax.conv_general_dilated(
        a, w_oihw, window_strides=(1, 1), padding="SAME",
        dimension_numbers=("NCHW", "OIHW", "NCHW"),
        precision=jax.lax.Precision.HIGHEST)
    return jnp.concatenate([x, out], axis=1)


if __name__ == "__main__":
    N, C_in, H, W = 2, 4, 16, 16      # numIn = 4
    C_out = 8                         # numOut = 8

    key = jax.random.PRNGKey(0)
    k1, k2, k3, k4, k5, k6 = jax.random.split(key, 6)

    x = jax.random.normal(k1, (N, C_in, H, W), jnp.float32)
    gamma = 1.0 + 0.1 * jax.random.normal(k2, (C_in,), jnp.float32)
    beta = 0.1 * jax.random.normal(k3, (C_in,), jnp.float32)
    running_mean = 0.1 * jax.random.normal(k4, (C_in,), jnp.float32)
    running_var = jax.random.uniform(k5, (C_in,), jnp.float32,
                                     minval=0.5, maxval=1.5)
    fan_in = C_in * 3 * 3
    conv_w = jax.random.normal(k6, (C_out, C_in, 3, 3), jnp.float32)
    conv_w = conv_w * (1.0 / (fan_in ** 0.5))

    out = basic_block_forward(x, gamma, beta, running_mean, running_var, conv_w)
    out = jax.block_until_ready(out)

    assert out.shape == (N, C_in + C_out, H, W), out.shape

    ref = reference_forward(x, gamma, beta, running_mean, running_var, conv_w)
    np.testing.assert_allclose(np.asarray(out), np.asarray(ref),
                               rtol=1e-4, atol=1e-4)

    print("KERNEL_OK")
</pallas_src>

<mosaic_0001>
module attributes {stable_mosaic.version = 11 : i64} {
  func.func @_basic_block_kernel(%arg0: i32, %arg1: memref<2x8x256xf32, #tpu.memory_space<vmem>>, %arg2: memref<8x1xf32, #tpu.memory_space<vmem>>, %arg3: memref<8x1xf32, #tpu.memory_space<vmem>>, %arg4: memref<8x72xf32, #tpu.memory_space<vmem>>, %arg5: memref<9x512xf32, #tpu.memory_space<vmem>>, %arg6: memref<2x8x256xf32, #tpu.memory_space<vmem>>) attributes {dimension_semantics = [#tpu.dimension_semantics<parallel>], iteration_bounds = array<i64: 1>, scalar_prefetch = 0 : i64, scratch_operands = 0 : i64, tpu.core_type = #tpu.core_type<tc>, window_params = [{transform_indices = @transform_0, window_bounds = array<i64: 2, 8, 256>}, {pipeline_mode = #tpu.pipeline_mode<synchronous>, transform_indices = @transform_1, window_bounds = array<i64: 8, 1>}, {pipeline_mode = #tpu.pipeline_mode<synchronous>, transform_indices = @transform_2, window_bounds = array<i64: 8, 1>}, {pipeline_mode = #tpu.pipeline_mode<synchronous>, transform_indices = @transform_3, window_bounds = array<i64: 8, 72>}, {pipeline_mode = #tpu.pipeline_mode<synchronous>, transform_indices = @transform_4, window_bounds = array<i64: 9, 512>}, {transform_indices = @transform_5, window_bounds = array<i64: 2, 8, 256>}]} {
    %c0 = arith.constant 0 : index
    %c0_0 = arith.constant 0 : index
    %c0_1 = arith.constant 0 : index
    %0 = vector.load %arg1[%c0, %c0_0, %c0_1] : memref<2x8x256xf32, #tpu.memory_space<vmem>>, vector<1x8x256xf32>
    %1 = vector.shape_cast %0 : vector<1x8x256xf32> to vector<8x256xf32>
    %c1 = arith.constant 1 : index
    %c0_2 = arith.constant 0 : index
    %c0_3 = arith.constant 0 : index
    %2 = vector.load %arg1[%c1, %c0_2, %c0_3] : memref<2x8x256xf32, #tpu.memory_space<vmem>>, vector<1x8x256xf32>
    %3 = vector.shape_cast %2 : vector<1x8x256xf32> to vector<8x256xf32>
    %4 = tpu.concatenate %1, %3 in 1 : vector<8x256xf32>, vector<8x256xf32> -> vector<8x512xf32>
    %c0_4 = arith.constant 0 : index
    %c0_5 = arith.constant 0 : index
    %5 = vector.load %arg2[%c0_4, %c0_5] : memref<8x1xf32, #tpu.memory_space<vmem>>, vector<8x1xf32>
    %6 = vector.broadcast %5 : vector<8x1xf32> to vector<8x512xf32>
    %7 = arith.mulf %4, %6 : vector<8x512xf32>
    %c0_6 = arith.constant 0 : index
    %c0_7 = arith.constant 0 : index
    %8 = vector.load %arg3[%c0_6, %c0_7] : memref<8x1xf32, #tpu.memory_space<vmem>>, vector<8x1xf32>
    %9 = vector.broadcast %8 : vector<8x1xf32> to vector<8x512xf32>
    %10 = arith.addf %7, %9 : vector<8x512xf32>
    %cst = arith.constant 0.000000e+00 : f32
    %11 = vector.broadcast %cst : f32 to vector<8x512xf32>
    %12 = arith.maximumf %10, %11 : vector<8x512xf32>
    %c17_i32 = arith.constant 17 : i32
    %13 = tpu.dynamic_rotate %12 by %c17_i32 dim 1 : vector<8x512xf32>, i32 -> vector<8x512xf32>
    %c0_8 = arith.constant 0 : index
    %c0_9 = arith.constant 0 : index
    %14 = vector.load %arg5[%c0_8, %c0_9] : memref<9x512xf32, #tpu.memory_space<vmem>>, vector<1x512xf32>
    %15 = vector.broadcast %14 : vector<1x512xf32> to vector<8x512xf32>
    %16 = arith.mulf %13, %15 : vector<8x512xf32>
    %c16_i32 = arith.constant 16 : i32
    %17 = tpu.dynamic_rotate %12 by %c16_i32 dim 1 : vector<8x512xf32>, i32 -> vector<8x512xf32>
    %c1_10 = arith.constant 1 : index
    %c0_11 = arith.constant 0 : index
    %18 = vector.load %arg5[%c1_10, %c0_11] : memref<9x512xf32, #tpu.memory_space<vmem>>, vector<1x512xf32>
    %19 = vector.broadcast %18 : vector<1x512xf32> to vector<8x512xf32>
    %20 = arith.mulf %17, %19 : vector<8x512xf32>
    %c15_i32 = arith.constant 15 : i32
    %21 = tpu.dynamic_rotate %12 by %c15_i32 dim 1 : vector<8x512xf32>, i32 -> vector<8x512xf32>
    %c2 = arith.constant 2 : index
    %c0_12 = arith.constant 0 : index
    %22 = vector.load %arg5[%c2, %c0_12] : memref<9x512xf32, #tpu.memory_space<vmem>>, vector<1x512xf32>
    %23 = vector.broadcast %22 : vector<1x512xf32> to vector<8x512xf32>
    %24 = arith.mulf %21, %23 : vector<8x512xf32>
    %c1_i32 = arith.constant 1 : i32
    %25 = tpu.dynamic_rotate %12 by %c1_i32 dim 1 : vector<8x512xf32>, i32 -> vector<8x512xf32>
    %c3 = arith.constant 3 : index
    %c0_13 = arith.constant 0 : index
    %26 = vector.load %arg5[%c3, %c0_13] : memref<9x512xf32, #tpu.memory_space<vmem>>, vector<1x512xf32>
    %27 = vector.broadcast %26 : vector<1x512xf32> to vector<8x512xf32>
    %28 = arith.mulf %25, %27 : vector<8x512xf32>
    %c511_i32 = arith.constant 511 : i32
    %29 = tpu.dynamic_rotate %12 by %c511_i32 dim 1 : vector<8x512xf32>, i32 -> vector<8x512xf32>
    %c5 = arith.constant 5 : index
    %c0_14 = arith.constant 0 : index
    %30 = vector.load %arg5[%c5, %c0_14] : memref<9x512xf32, #tpu.memory_space<vmem>>, vector<1x512xf32>
    %31 = vector.broadcast %30 : vector<1x512xf32> to vector<8x512xf32>
    %32 = arith.mulf %29, %31 : vector<8x512xf32>
    %c497_i32 = arith.constant 497 : i32
    %33 = tpu.dynamic_rotate %12 by %c497_i32 dim 1 : vector<8x512xf32>, i32 -> vector<8x512xf32>
    %c6 = arith.constant 6 : index
    %c0_15 = arith.constant 0 : index
    %34 = vector.load %arg5[%c6, %c0_15] : memref<9x512xf32, #tpu.memory_space<vmem>>, vector<1x512xf32>
    %35 = vector.broadcast %34 : vector<1x512xf32> to vector<8x512xf32>
    %36 = arith.mulf %33, %35 : vector<8x512xf32>
    %c496_i32 = arith.constant 496 : i32
    %37 = tpu.dynamic_rotate %12 by %c496_i32 dim 1 : vector<8x512xf32>, i32 -> vector<8x512xf32>
    %c7 = arith.constant 7 : index
    %c0_16 = arith.constant 0 : index
    %38 = vector.load %arg5[%c7, %c0_16] : memref<9x512xf32, #tpu.memory_space<vmem>>, vector<1x512xf32>
    %39 = vector.broadcast %38 : vector<1x512xf32> to vector<8x512xf32>
    %40 = arith.mulf %37, %39 : vector<8x512xf32>
    %c495_i32 = arith.constant 495 : i32
    %41 = tpu.dynamic_rotate %12 by %c495_i32 dim 1 : vector<8x512xf32>, i32 -> vector<8x512xf32>
    %c8 = arith.constant 8 : index
    %c0_17 = arith.constant 0 : index
    %42 = vector.load %arg5[%c8, %c0_17] : memref<9x512xf32, #tpu.memory_space<vmem>>, vector<1x512xf32>
    %43 = vector.broadcast %42 : vector<1x512xf32> to vector<8x512xf32>
    %44 = arith.mulf %41, %43 : vector<8x512xf32>
    %45 = tpu.concatenate %16, %20, %24, %28, %12, %32, %36, %40, %44 in 0 : vector<8x512xf32>, vector<8x512xf32>, vector<8x512xf32>, vector<8x512xf32>, vector<8x512xf32>, vector<8x512xf32>, vector<8x512xf32>, vector<8x512xf32>, vector<8x512xf32> -> vector<72x512xf32>
    %c0_18 = arith.constant 0 : index
    %c0_19 = arith.constant 0 : index
    %46 = vector.load %arg4[%c0_18, %c0_19] : memref<8x72xf32, #tpu.memory_space<vmem>>, vector<8x72xf32>
    %cst_20 = arith.constant dense<0.000000e+00> : vector<8x512xf32>
    %47 = tpu.matmul %46, %45, %cst_20 {dimension_numbers = #tpu.dot_dimension_numbers<[1], [0], [0], [1], [0, 0, 1, 1], [], []>} : vector<8x72xf32>, vector<72x512xf32>, vector<8x512xf32> -> vector<8x512xf32>
    %48 = vector.extract_strided_slice %47 {offsets = [0, 0], sizes = [8, 256], strides = [1, 1]} : vector<8x512xf32> to vector<8x256xf32>
    %c0_21 = arith.constant 0 : index
    %c0_22 = arith.constant 0 : index
    %c0_23 = arith.constant 0 : index
    %49 = vector.load %arg6[%c0_21, %c0_22, %c0_23] : memref<2x8x256xf32, #tpu.memory_space<vmem>>, vector<1x8x256xf32>
    %50 = vector.shape_cast %49 : vector<1x8x256xf32> to vector<8x256xf32>
    %51 = vector.shape_cast %48 : vector<8x256xf32> to vector<1x8x256xf32>
    tpu.vector_store %arg6[%c0_21, %c0_22, %c0_23], %51 {strides = array<i32>} : memref<2x8x256xf32, #tpu.memory_space<vmem>>, vector<1x8x256xf32>,
    %52 = vector.extract_strided_slice %47 {offsets = [0, 256], sizes = [8, 256], strides = [1, 1]} : vector<8x512xf32> to vector<8x256xf32>
    %c1_24 = arith.constant 1 : index
    %c0_25 = arith.constant 0 : index
    %c0_26 = arith.constant 0 : index
    %53 = vector.load %arg6[%c1_24, %c0_25, %c0_26] : memref<2x8x256xf32, #tpu.memory_space<vmem>>, vector<1x8x256xf32>
    %54 = vector.shape_cast %53 : vector<1x8x256xf32> to vector<8x256xf32>
    %55 = vector.shape_cast %52 : vector<8x256xf32> to vector<1x8x256xf32>
    tpu.vector_store %arg6[%c1_24, %c0_25, %c0_26], %55 {strides = array<i32>} : memref<2x8x256xf32, #tpu.memory_space<vmem>>, vector<1x8x256xf32>,
    return
  }
  func.func @transform_0(%arg0: i32) -> (i32, i32, i32) {
    %c0_i32 = arith.constant 0 : i32
    %c0_i32_0 = arith.constant 0 : i32
    %c0_i32_1 = arith.constant 0 : i32
    return %arg0, %c0_i32, %c0_i32_0 : i32, i32, i32
  }
  func.func @transform_1(%arg0: i32) -> (i32, i32) {
    %c0_i32 = arith.constant 0 : i32
    %c0_i32_0 = arith.constant 0 : i32
    %c0_i32_1 = arith.constant 0 : i32
    return %c0_i32, %c0_i32_0 : i32, i32
  }
  func.func @transform_2(%arg0: i32) -> (i32, i32) {
    %c0_i32 = arith.constant 0 : i32
    %c0_i32_0 = arith.constant 0 : i32
    %c0_i32_1 = arith.constant 0 : i32
    return %c0_i32, %c0_i32_0 : i32, i32
  }
  func.func @transform_3(%arg0: i32) -> (i32, i32) {
    %c0_i32 = arith.constant 0 : i32
    %c0_i32_0 = arith.constant 0 : i32
    %c0_i32_1 = arith.constant 0 : i32
    return %c0_i32, %c0_i32_0 : i32, i32
  }
  func.func @transform_4(%arg0: i32) -> (i32, i32) {
    %c0_i32 = arith.constant 0 : i32
    %c0_i32_0 = arith.constant 0 : i32
    %c0_i32_1 = arith.constant 0 : i32
    return %c0_i32, %c0_i32_0 : i32, i32
  }
  func.func @transform_5(%arg0: i32) -> (i32, i32, i32) {
    %c0_i32 = arith.constant 0 : i32
    %c0_i32_0 = arith.constant 0 : i32
    %c0_i32_1 = arith.constant 0 : i32
    return %arg0, %c0_i32, %c0_i32_0 : i32, i32, i32
  }
}

</mosaic_0001>

<bundles_post_ra>
// kernel: tpu_custom_call.1
= control target key start
LH: loop header
LB: loop body
LE: loop exit
PB: predicated region body
PF: predicated region fallthrough
CT: control target
= control target key end

     0   :  { %10 = vsyncpa [#allocation3], 0  ;;  %s886_s0 = inlined_call_operand.hbm [shape: f32[2,8,256], index: 0, kind: input, shape index: {}]   ;;  %s887_s1 = inlined_call_operand.vmem [shape: f32[8,1], index: 1, kind: input, shape index: {}]   ;;  %s888_s2 = inlined_call_operand.vmem [shape: f32[8,1], index: 2, kind: input, shape index: {}]   ;;  %s889_s3 = inlined_call_operand.vmem [shape: f32[8,72], index: 3, kind: input, shape index: {}]   ;;  %s890_s4 = inlined_call_operand.hbm [shape: f32[9,512], index: 4, kind: input, shape index: {}]   ;;  %s891_s5 = inlined_call_operand.hbm [shape: f32[2,8,256], index: 5, kind: output, shape index: {}]  }
   0x1   :  { %11 = vsyncpa [#allocation6], 0 }
   0x2   :  { %12 = vsyncpa [#allocation4], 0  ;;  %s654_s18 = smov [#allocation2]  }
   0x3   :  { %s18_s19 = sshll.u32 %s654_s18, 4  ;;  %s19_s19 = int_to_ptr.vmem [resolvable:$true] %s18_s19 }
   0x4   :  { %s596_s20 = scalar_lea.vmem %s19_s19, 512  ;;  %p601_p1 = scmp.lt.s32.totalorder %s19_s19, %s19_s19 }
   0x5   :  { %p597_p0 = scmp.ne.s32.totalorder %s19_s19, %s596_s20  ;;  %p602_p2 = scmp.lt.s32.totalorder %s596_s20, %s596_s20 }
   0x7   :  { %p603_p3 = por %p602_p2, %p601_p1 }
   0x9   :  { %p604_p4 = pnand %p603_p3, %p597_p0 }
   0xb   :  { %607 = shalt.err (!%p604_p4)
}
   0xc   :  { %s655_s21 = smov 256   ;;  %s656_s22 = smov 16  }
   0xd   :  { %24 = dma.hbm_to_vmem [thread:$0]  %s886_s0, 512, %s19_s19, [#allocation3], %s655_s21, %s655_s21, %s656_s22  }
   0xe   :  { %s657_s25 = smov [#allocation5]  }
   0xf   :  { %s36_s26 = sshll.u32 %s657_s25, 4  ;;  %s37_s26 = int_to_ptr.vmem [resolvable:$true] %s36_s26 }
  0x10   :  { %s616_s27 = scalar_lea.vmem %s37_s26, 1024  ;;  %p621_p6 = scmp.lt.s32.totalorder %s37_s26, %s37_s26 }
  0x11   :  { %p617_p5 = scmp.ne.s32.totalorder %s37_s26, %s616_s27  ;;  %p622_p7 = scmp.lt.s32.totalorder %s616_s27, %s616_s27 }
  0x13   :  { %p623_p8 = por %p622_p7, %p621_p6 }
  0x15   :  { %p624_p9 = pnand %p623_p8, %p617_p5 }
  0x17   :  { %627 = shalt.err (!%p624_p9)
}
  0x18   :  { %s658_s28 = smov 512   ;;  %s659_s29 = smov 32  }
  0x19   :  { %42 = dma.hbm_to_vmem [thread:$0]  %s890_s4, 1024, %s37_s26, [#allocation6], %s658_s28, %s658_s28, %s659_s29  }
  0x1a   :  { %648 = dma.done.wait [#allocation3], 512  }
  0x1b   :  { %649 = vsyncadd [#allocation3], 4294966784 }
  0x1c   :  { %650 = dma.done.wait [#allocation6], 1024  }
  0x1d   :  { %651 = vsyncadd [#allocation6], 4294966272  ;;  %v660_v0 = vmov 0   ;;  %v54_v1 = vld [vmem:[%s887_s1] sm:$0xff]  ;;  %v52_v5 = vld [vmem:[#allocation2 + $0x10] sm:$0xff]  ;;  %s661_s1 = smov 111   ;;  %v86_v22 = vlaneseq }
  0x1e   :  { %587 = vset.pattern.permute.xlu0 %v660_v0  ;;  %v64_v2 = vld [vmem:[%s888_s2] sm:$0xff]  ;;  %v50_v6 = vld [vmem:[#allocation2 + $0x8] sm:$0xff]  ;;  %v53_v13 = vld [vmem:[#allocation2 + $0x18] sm:$0xff]  ;;  %s662_s2 = smov 112   ;;  %s663_s4 = smov 113   ;;  %v668_v21 = vmov 0.0  }
  0x1f   :  { %57 = vperm.xlu0 %587, %v54_v1   ;;  %v49_v4 = vld [vmem:[#allocation2] sm:$0xff]  ;;  %s664_s10 = smov 127   ;;  %s665_s11 = smov 1   ;;  %468 = vmatprep.mubr.f32.mxu0 %v668_v21  ;;  %v96_v23 = vshrl.u32 %v86_v22, 7  ;;  %v759_v24 = vand.u32 127, %v86_v22  ;;  %vm400_vm8 = vcmask 588800  }
  0x20   :  { %s666_s12 = smov 15   ;;  %s667_s13 = smov 17   ;;  %539 = vmatprep.mubr.f32.mxu1 %v668_v21  ;;  %v373_v27 = vld [vmem:[#allocation5 + $0x20] ss:$8 sm:$0xf] }
  0x21   :  { %v761_v25 = vsub.s32 1, %v96_v23  ;;  %v763_v26 = vsub.s32 0, %v96_v23  ;;  %vm367_vm0 = vcmp.lt.s32.totalorder %v759_v24, 111  ;;  %v768_v32 = vsub.s32 3, %v96_v23  ;;  %s669_s16 = smov [#allocation7]  }
  0x22   :  { %v770_v33 = vsub.s32 2, %v96_v23  ;;  %v333_v42 = vld [vmem:[#allocation5 + $0x7] ss:$8 sm:$0xf]  ;;  %vm327_vm1 = vcmp.lt.s32.totalorder %v759_v24, 112  ;;  %vm287_vm2 = vcmp.lt.s32.totalorder %v759_v24, 113 }
  0x23   :  { %67 = vperm.xlu0 %587, %v64_v2   ;;  %v382_v30 = vrot.slane %v373_v27, %v761_v25  ;;  %v378_v31 = vrot.slane %v373_v27, %v763_v26  ;;  %v390_v40 = vrot.slane %v373_v27, %v768_v32  ;;  %v338_v48 = vrot.slane %v333_v42, %v763_v26  ;;  %v293_v59 = vld [vmem:[#allocation5 + $0x6] ss:$8 sm:$0xf]  ;;  %s556_s17 = sshll.u32 %s669_s16, 4  ;;  %s557_s17 = int_to_ptr.vmem [resolvable:$true] %s556_s17 }
  0x24   :  { %v386_v41 = vrot.slane %v373_v27, %v770_v33  ;;  %v342_v49 = vrot.slane %v333_v42, %v761_v25  ;;  %v346_v57 = vrot.slane %v333_v42, %v770_v33  ;;  %v350_v58 = vrot.slane %v333_v42, %v768_v32  ;;  %s628_s18 = scalar_lea.vmem %s557_s17, 512  ;;  %p633_p11 = scmp.lt.s32.totalorder %s557_s17, %s557_s17 }
  0x25   :  { %v298_v2 = vrot.slane %v293_v59, %v763_v26  ;;  %vm247_vm3 = vcmp.lt.s32.totalorder %v759_v24, 127  ;;  %vm207_vm4 = vcmp.lt.s32.totalorder %v759_v24, 1  ;;  %vm167_vm5 = vcmp.lt.s32.totalorder %v759_v24, 15  ;;  %p629_p10 = scmp.ne.s32.totalorder %s557_s17, %s628_s18  ;;  %p634_p12 = scmp.lt.s32.totalorder %s628_s18, %s628_s18 }
  0x26   :  { %vm127_vm6 = vcmp.lt.s32.totalorder %v759_v24, 16  ;;  %vm88_vm7 = vcmp.lt.s32.totalorder %v759_v24, 17 }
  0x27   :  { %p635_p13 = por %p634_p12, %p633_p11 }
  0x29   :  { %p636_p0 = pnand %p635_p13, %p629_p10 }
  0x9a   :  { %v58_v3 = vpop.permute.xlu0 %57 }
  0x9b   :  { %v60_v7 = vmul.f32 %v58_v3, %v49_v4  ;;  %v62_v8 = vmul.f32 %v58_v3, %v52_v5  ;;  %v61_v10 = vmul.f32 %v58_v3, %v50_v6  ;;  %v63_v17 = vmul.f32 %v58_v3, %v53_v13 }
  0x9c   :  { %v302_v3 = vrot.slane %v293_v59, %v761_v25 }
  0x9e   :  { %v68_v9 = vpop.permute.xlu0 %67 }
  0x9f   :  { %v70_v11 = vadd.f32 %v68_v9, %v60_v7  ;;  %v72_v12 = vadd.f32 %v68_v9, %v62_v8  ;;  %v71_v14 = vadd.f32 %v68_v9, %v61_v10  ;;  %v73_v18 = vadd.f32 %v68_v9, %v63_v17 }
  0xa0   :  { %v306_v10 = vrot.slane %v293_v59, %v770_v33 }
  0xa1   :  { %v715_v15 = vmax.f32 %v70_v11, 0.0  ;;  %v717_v16 = vmax.f32 %v72_v12, 0.0  ;;  %v721_v19 = vmax.f32 %v71_v14, 0.0  ;;  %v725_v20 = vmax.f32 %v73_v18, 0.0 }
  0xa2   :  { %v310_v11 = vrot.slane %v293_v59, %v768_v32  ;;  %v253_v12 = vld [vmem:[#allocation5 + $0x5] ss:$8 sm:$0xf] }
  0xa3   :  { %363 = vrot.lane.b32.xlu0 %v717_v16, %s661_s1  ;;  %359 = vrot.lane.b32.xlu1 %v715_v15, %s661_s1  ;;  %v258_v23 = vrot.slane %v253_v12, %v763_v26  ;;  %v262_v27 = vrot.slane %v253_v12, %v761_v25 }
  0xa7   :  { %319 = vrot.lane.b32.xlu0 %v715_v15, %s662_s2  ;;  %361 = vrot.lane.b32.xlu1 %v721_v19, %s661_s1 }
  0xab   :  { %323 = vrot.lane.b32.xlu0 %v717_v16, %s662_s2  ;;  %365 = vrot.lane.b32.xlu1 %v725_v20, %s661_s1 }
  0xaf   :  { %279 = vrot.lane.b32.xlu0 %v715_v15, %s663_s4  ;;  %321 = vrot.lane.b32.xlu1 %v721_v19, %s662_s2 }
  0xb3   :  { %283 = vrot.lane.b32.xlu0 %v717_v16, %s663_s4  ;;  %325 = vrot.lane.b32.xlu1 %v725_v20, %s662_s2 }
  0xb7   :  { %239 = vrot.lane.b32.xlu0 %v715_v15, %s664_s10  ;;  %281 = vrot.lane.b32.xlu1 %v721_v19, %s663_s4 }
  0xbb   :  { %243 = vrot.lane.b32.xlu0 %v717_v16, %s664_s10  ;;  %285 = vrot.lane.b32.xlu1 %v725_v20, %s663_s4 }
  0xbf   :  { %199 = vrot.lane.b32.xlu0 %v715_v15, %s665_s11  ;;  %241 = vrot.lane.b32.xlu1 %v721_v19, %s664_s10 }
  0xc3   :  { %203 = vrot.lane.b32.xlu0 %v717_v16, %s665_s11  ;;  %245 = vrot.lane.b32.xlu1 %v725_v20, %s664_s10 }
  0xc7   :  { %159 = vrot.lane.b32.xlu0 %v715_v15, %s666_s12  ;;  %201 = vrot.lane.b32.xlu1 %v721_v19, %s665_s11 }
  0xcb   :  { %163 = vrot.lane.b32.xlu0 %v717_v16, %s666_s12  ;;  %205 = vrot.lane.b32.xlu1 %v725_v20, %s665_s11 }
  0xcf   :  { %119 = vrot.lane.b32.xlu0 %v715_v15, %s656_s22  ;;  %161 = vrot.lane.b32.xlu1 %v721_v19, %s666_s12 }
  0xd3   :  { %123 = vrot.lane.b32.xlu0 %v717_v16, %s656_s22  ;;  %165 = vrot.lane.b32.xlu1 %v725_v20, %s666_s12 }
  0xd7   :  { %78 = vrot.lane.b32.xlu0 %v715_v15, %s667_s13  ;;  %121 = vrot.lane.b32.xlu1 %v721_v19, %s656_s22 }
  0xdb   :  { %82 = vrot.lane.b32.xlu0 %v717_v16, %s667_s13  ;;  %125 = vrot.lane.b32.xlu1 %v725_v20, %s656_s22 }
  0xdf   :  { %80 = vrot.lane.b32.xlu1 %v721_v19, %s667_s13 }
  0xe3   :  { %84 = vrot.lane.b32.xlu1 %v725_v20, %s667_s13 }
 0x115   :  { %v364_v28 = vpop.permute.xlu0 %363  ;;  %v360_v29 = vpop.permute.xlu1 %359 }
 0x119   :  { %v320_v34 = vpop.permute.xlu0 %319  ;;  %v362_v35 = vpop.permute.xlu1 %361 }
 0x11a   :  { %v370_v36 = vsel %vm367_vm0, %v360_v29, %v362_v35  ;;  %v369_v37 = vsel %vm367_vm0, %v362_v35, %v364_v28 }
 0x11b   :  { %v396_v38 = vmul.f32 %v382_v30, %v369_v37  ;;  %v395_v39 = vmul.f32 %v378_v31, %v370_v36  ;;  %v266_v36 = vrot.slane %v253_v12, %v770_v33  ;;  %v270_v37 = vrot.slane %v253_v12, %v768_v32 }
 0x11d   :  { %v324_v43 = vpop.permute.xlu0 %323  ;;  %418 = vmatprep.subr.mxu0 %v396_v38  ;;  %v366_v44 = vpop.permute.xlu1 %365  ;;  %v213_v38 = vld [vmem:[#allocation5 + $0x3] ss:$8 sm:$0xf] }
 0x11e   :  { %v368_v45 = vsel %vm367_vm0, %v364_v28, %v366_v44  ;;  %419 = vmatpush1.msra.mxu0 %v395_v39  ;;  %v371_v46 = vsel %vm367_vm0, %v366_v44, %v360_v29 }
 0x11f   :  { %v398_v47 = vmul.f32 %v390_v40, %v371_v46  ;;  %v397_v50 = vmul.f32 %v386_v41, %v368_v45  ;;  %v222_v45 = vrot.slane %v213_v38, %v761_v25 }
 0x121   :  { %v280_v51 = vpop.permute.xlu0 %279  ;;  %489 = vmatprep.subr.mxu1 %v398_v47  ;;  %v322_v52 = vpop.permute.xlu1 %321 }
 0x122   :  { %v329_v53 = vsel %vm327_vm1, %v322_v52, %v324_v43  ;;  %v330_v54 = vsel %vm327_vm1, %v320_v34, %v322_v52  ;;  %490 = vmatpush1.msra.mxu1 %v397_v50  ;;  %v218_v50 = vrot.slane %v213_v38, %v763_v26  ;;  %v173_v52 = vld [vmem:[#allocation5 + $0x2] ss:$8 sm:$0xf] }
 0x123   :  { %v355_v55 = vmul.f32 %v338_v48, %v330_v54  ;;  %v356_v56 = vmul.f32 %v342_v49, %v329_v53 }
 0x125   :  { %v284_v60 = vpop.permute.xlu0 %283  ;;  %420 = vmatprep.subr.mxu0 %v356_v56  ;;  %v326_v61 = vpop.permute.xlu1 %325 }
 0x126   :  { %v328_v62 = vsel %vm327_vm1, %v324_v43, %v326_v61  ;;  %v331_v63 = vsel %vm327_vm1, %v326_v61, %v320_v34  ;;  %421 = vmatpush1.msra.mxu0 %v355_v55 }
 0x127   :  { %v357_v0 = vmul.f32 %v346_v57, %v328_v62  ;;  %v358_v1 = vmul.f32 %v350_v58, %v331_v63  ;;  %v182_v58 = vrot.slane %v173_v52, %v761_v25  ;;  %v178_v63 = vrot.slane %v173_v52, %v763_v26 }
 0x129   :  { %v240_v4 = vpop.permute.xlu0 %239  ;;  %491 = vmatprep.subr.mxu1 %v358_v1  ;;  %v282_v5 = vpop.permute.xlu1 %281  ;;  %v186_v1 = vrot.slane %v173_v52, %v770_v33 }
 0x12a   :  { %v289_v6 = vsel %vm287_vm2, %v282_v5, %v284_v60  ;;  %v290_v7 = vsel %vm287_vm2, %v280_v51, %v282_v5  ;;  %492 = vmatpush1.msra.mxu1 %v357_v0  ;;  %v190_v0 = vrot.slane %v173_v52, %v768_v32 }
 0x12b   :  { %v315_v8 = vmul.f32 %v298_v2, %v290_v7  ;;  %v316_v9 = vmul.f32 %v302_v3, %v289_v6  ;;  %v133_v2 = vld [vmem:[#allocation5 + $0x1] ss:$8 sm:$0xf] }
 0x12d   :  { %v244_v13 = vpop.permute.xlu0 %243  ;;  %422 = vmatprep.subr.mxu0 %v316_v9  ;;  %v286_v14 = vpop.permute.xlu1 %285  ;;  %v142_v9 = vrot.slane %v133_v2, %v761_v25 }
 0x12e   :  { %v288_v17 = vsel %vm287_vm2, %v284_v60, %v286_v14  ;;  %v291_v18 = vsel %vm287_vm2, %v286_v14, %v280_v51  ;;  %423 = vmatpush1.msra.mxu0 %v315_v8  ;;  %v226_v51 = vrot.slane %v213_v38, %v770_v33 }
 0x12f   :  { %v317_v21 = vmul.f32 %v306_v10, %v288_v17  ;;  %v318_v22 = vmul.f32 %v310_v11, %v291_v18  ;;  %v138_v17 = vrot.slane %v133_v2, %v763_v26  ;;  %v150_v18 = vrot.slane %v133_v2, %v768_v32 }
 0x131   :  { %v200_v28 = vpop.permute.xlu0 %199  ;;  %493 = vmatprep.subr.mxu1 %v318_v22  ;;  %v242_v29 = vpop.permute.xlu1 %241  ;;  %v93_v22 = vld [vmem:[#allocation5] ss:$8 sm:$0xf] }
 0x132   :  { %v249_v30 = vsel %vm247_vm3, %v242_v29, %v244_v13  ;;  %v250_v31 = vsel %vm247_vm3, %v240_v4, %v242_v29  ;;  %494 = vmatpush1.msra.mxu1 %v317_v21  ;;  %v146_v21 = vrot.slane %v133_v2, %v770_v33 }
 0x133   :  { %v275_v34 = vmul.f32 %v258_v23, %v250_v31  ;;  %v276_v35 = vmul.f32 %v262_v27, %v249_v30 }
 0x135   :  { %v204_v39 = vpop.permute.xlu0 %203  ;;  %424 = vmatprep.subr.mxu0 %v276_v35  ;;  %v246_v40 = vpop.permute.xlu1 %245  ;;  %v102_v35 = vrot.slane %v93_v22, %v761_v25 }
 0x136   :  { %v248_v41 = vsel %vm247_vm3, %v244_v13, %v246_v40  ;;  %v251_v42 = vsel %vm247_vm3, %v246_v40, %v240_v4  ;;  %425 = vmatpush1.msra.mxu0 %v275_v34  ;;  %v98_v40 = vrot.slane %v93_v22, %v763_v26  ;;  %v399_v26 = vld [vmem:[%s889_s3] sm:$0xff] }
 0x137   :  { %v277_v43 = vmul.f32 %v266_v36, %v248_v41  ;;  %v278_v44 = vmul.f32 %v270_v37, %v251_v42  ;;  %426 = vmatprep.subr.mxu0 %v721_v19  ;;  %v230_v19 = vrot.slane %v213_v38, %v768_v32  ;;  %v110_v41 = vrot.slane %v93_v22, %v768_v32 }
 0x138   :  { %427 = vmatpush1.msra.mxu0 %v715_v15 }
 0x139   :  { %v160_v46 = vpop.permute.xlu0 %159  ;;  %495 = vmatprep.subr.mxu1 %v278_v44  ;;  %v202_v47 = vpop.permute.xlu1 %201 }
 0x13a   :  { %v210_v48 = vsel %vm207_vm4, %v200_v28, %v202_v47  ;;  %496 = vmatpush1.msra.mxu1 %v277_v43  ;;  %v209_v15 = vsel %vm207_vm4, %v202_v47, %v204_v39  ;;  %v106_v43 = vrot.slane %v93_v22, %v770_v33 }
 0x13b   :  { %v236_v49 = vmul.f32 %v222_v45, %v210_v48  ;;  %497 = vmatprep.subr.mxu1 %v725_v20 }
 0x13c   :  { %498 = vmatpush1.msra.mxu1 %v717_v16  ;;  %v237_v16 = vmul.f32 %v226_v51, %v209_v15 }
 0x13d   :  { %v164_v53 = vpop.permute.xlu0 %163  ;;  %428 = vmatprep.subr.mxu0 %v236_v49  ;;  %v206_v54 = vpop.permute.xlu1 %205 }
 0x13e   :  { %v208_v55 = vsel %vm207_vm4, %v204_v39, %v206_v54  ;;  %v211_v20 = vsel %vm207_vm4, %v206_v54, %v200_v28 }
 0x13f   :  { %v235_v56 = vmul.f32 %v218_v50, %v211_v20  ;;  %v238_v57 = vmul.f32 %v230_v19, %v208_v55 }
 0x141   :  { %429 = vmatpush1.msra.mxu0 %v235_v56  ;;  %499 = vmatprep.subr.mxu1 %v238_v57  ;;  %v162_v59 = vpop.permute.xlu1 %161  ;;  %v120_v60 = vpop.permute.xlu0 %119 }
 0x142   :  { %v170_v61 = vsel %vm167_vm5, %v160_v46, %v162_v59  ;;  %500 = vmatpush1.msra.mxu1 %v237_v16  ;;  %v169_v3 = vsel %vm167_vm5, %v162_v59, %v164_v53 }
 0x143   :  { %v196_v62 = vmul.f32 %v182_v58, %v170_v61  ;;  %v197_v10 = vmul.f32 %v186_v1, %v169_v3 }
 0x145   :  { %430 = vmatprep.subr.mxu0 %v196_v62  ;;  %v166_v4 = vpop.permute.xlu1 %165  ;;  %v124_v11 = vpop.permute.xlu0 %123 }
 0x146   :  { %v168_v5 = vsel %vm167_vm5, %v164_v53, %v166_v4  ;;  %v171_v6 = vsel %vm167_vm5, %v166_v4, %v160_v46 }
 0x147   :  { %v195_v7 = vmul.f32 %v178_v63, %v171_v6  ;;  %v198_v8 = vmul.f32 %v190_v0, %v168_v5 }
 0x149   :  { %431 = vmatpush1.msra.mxu0 %v195_v7  ;;  %501 = vmatprep.subr.mxu1 %v198_v8  ;;  %v122_v12 = vpop.permute.xlu1 %121  ;;  %v79_v28 = vpop.permute.xlu0 %78 }
 0x14a   :  { %v130_v13 = vsel %vm127_vm6, %v120_v60, %v122_v12  ;;  %502 = vmatpush1.msra.mxu1 %v197_v10  ;;  %v129_v23 = vsel %vm127_vm6, %v122_v12, %v124_v11 }
 0x14b   :  { %v156_v14 = vmul.f32 %v142_v9, %v130_v13  ;;  %v157_v36 = vmul.f32 %v146_v21, %v129_v23 }
 0x14d   :  { %432 = vmatprep.subr.mxu0 %v156_v14  ;;  %v126_v27 = vpop.permute.xlu1 %125  ;;  %v83_v42 = vpop.permute.xlu0 %82 }
 0x14e   :  { %v128_v29 = vsel %vm127_vm6, %v124_v11, %v126_v27  ;;  %v131_v30 = vsel %vm127_vm6, %v126_v27, %v120_v60 }
 0x14f   :  { %v155_v31 = vmul.f32 %v138_v17, %v131_v30  ;;  %v158_v34 = vmul.f32 %v150_v18, %v128_v29 }
 0x151   :  { %433 = vmatpush1.msra.mxu0 %v155_v31  ;;  %503 = vmatprep.subr.mxu1 %v158_v34  ;;  %v81_v37 = vpop.permute.xlu1 %80 }
 0x152   :  { %v91_v38 = vsel %vm88_vm7, %v79_v28, %v81_v37  ;;  %504 = vmatpush1.msra.mxu1 %v157_v36  ;;  %v90_v44 = vsel %vm88_vm7, %v81_v37, %v83_v42 }
 0x153   :  { %v116_v39 = vmul.f32 %v102_v35, %v91_v38  ;;  %v117_v32 = vmul.f32 %v106_v43, %v90_v44 }
 0x155   :  { %434 = vmatprep.subr.mxu0 %v116_v39  ;;  %v85_v25 = vpop.permute.xlu1 %84 }
 0x156   :  { %v89_v45 = vsel %vm88_vm7, %v83_v42, %v85_v25  ;;  %v92_v46 = vsel %vm88_vm7, %v85_v25, %v79_v28 }
 0x157   :  { %v115_v47 = vmul.f32 %v98_v40, %v92_v46  ;;  %v118_v48 = vmul.f32 %v110_v41, %v89_v45 }
 0x159   :  { %435 = vmatpush1.msra.mxu0 %v115_v47  ;;  %505 = vmatprep.subr.mxu1 %v118_v48 }
 0x15a   :  { %569 = vmatmul.mubr.msk.f32.vlgmr.msra.gmra.mxu0 %vm400_vm8, %v399_v26  ;;  %506 = vmatpush1.msra.mxu1 %v117_v32 }
 0x15b   :  { %570 = vmatmul.mubr.msk.f32.vlgmr.msra.gmra.mxu1 %vm400_vm8, %v399_v26 }
 0x21a   :  { %v470_v33 = vpop.f32.mrf.mxu0 }
 0x21b   :  { %546 = vst [vmem:[#allocation7] sm:$0xff] %v470_v33  ;;  %v541_v49 = vpop.f32.mrf.mxu1 }
 0x21c   :  { %549 = vst [vmem:[#allocation7 + $0x10] sm:$0xff] %v541_v49  ;;  %v472_v24 = vpop.f32.mrf.mxu0 }
 0x21d   :  { %547 = vst [vmem:[#allocation7 + $0x8] sm:$0xff] %v472_v24  ;;  %v543_v50 = vpop.f32.mrf.mxu1 }
 0x21e   :  { %550 = vst [vmem:[#allocation7 + $0x18] sm:$0xff] %v543_v50 }
 0x21f   :  { %639 = shalt.err (!%p636_p0)
}
 0x220   :  { %562 = dma.vmem_to_hbm [thread:$0]  %s557_s17, 512, %s891_s5, [#allocation4], %s655_s21, %s655_s21, %s656_s22  }
 0x221   :  { %652 = dma.done.wait [#allocation4], 512  }
 0x222   :  { %653 = vsyncadd [#allocation4], 4294966784 }
 0x223   :  { %566 = vsyncpa [#allocation3], 1 }
 0x224   :  { %567 = vsyncpa [#allocation6], 1 }
 0x225   :  { %568 = vsyncpa [#allocation4], 1 }

</bundles_post_ra>
